<compile_context>
chip_gen: v5e
topology: v5e:2x2
jax: 0.10.0
libtpu: 0.0.40
codegen_flags: <defaults>
</compile_context>

<pallas_src>
import functools

import jax
import jax.numpy as jnp
from jax.experimental import pallas as pl
from jax.experimental.pallas import tpu as pltpu

_POOL = 2  # nn.MaxPool1d(kernel_size=2) in the reference module


def _cicr_conv_kernel(x_ref, w_ref, b_ref, o_ref, *, Cin, K):
    # x_ref: (2, Cin, Lh, TB)  even/odd phases, length on sublanes, batch on lanes
    # w_ref: (Cout*Cin*K,)     conv weights, flattened, in SMEM
    # b_ref: (Cout,)           conv bias, in SMEM
    # o_ref: (Cout, Lp, TB)    pooled output, batch on lanes (lane-dense store)
    Cout, Lp, _ = o_ref.shape

    # Conv taps read statically shifted slices of one phase; the slices do not
    # depend on the output channel, so load each distinct slice exactly once.
    slices = {}

    def tap(src, ci, j):
        key = (src, ci, j)
        if key not in slices:
            slices[key] = x_ref[src, ci, j:j + Lp, :].astype(jnp.float32)
        return slices[key]

    for c in range(Cout):                       # static unroll (Cout = 9)
        acc_e = None                            # conv at even outputs t = 2p
        acc_o = None                            # conv at odd  outputs t = 2p+1
        for ci in range(Cin):                   # static unroll (Cin = 1)
            for k in range(K):                  # static unroll (K = 3)
                w = w_ref[c * Cin * K + ci * K + k]     # scalar from SMEM
                if k % 2 == 0:
                    xe_s = tap(0, ci, k // 2)          # x[2p  +k] = even[p+k/2]
                    xo_s = tap(1, ci, k // 2)          # x[2p+1+k] = odd [p+k/2]
                else:
                    xe_s = tap(1, ci, k // 2)          # x[2p  +k] = odd [p+(k-1)/2]
                    xo_s = tap(0, ci, (k + 1) // 2)    # x[2p+1+k] = even[p+(k+1)/2]
                acc_e = w * xe_s if acc_e is None else acc_e + w * xe_s
                acc_o = w * xo_s if acc_o is None else acc_o + w * xo_s
        # MaxPool1d(2) collapses to one maximum; bias and tanh commute with it.
        pooled = jnp.maximum(acc_e, acc_o) + b_ref[c]
        o_ref[c] = jnp.tanh(pooled).astype(o_ref.dtype)


def cicr_conv_forward(x, weight, bias, *, vmem_budget_bytes=8 * 1024 * 1024,
                      max_tb=2048):
    """Forward pass of cicr_conv.

    x:      (B, L, Cin)    -- layout the PyTorch module receives
    weight: (Cout, Cin, K) -- PyTorch Conv1d weight layout
    bias:   (Cout,)
    returns (B, Lp, Cout), Lp = (L - K + 1) // 2
    """
    B, L, Cin = x.shape
    Cout, Cin_w, K = weight.shape
    assert Cin_w == Cin
    Lc = L - K + 1
    assert Lc >= _POOL, "sequence too short for conv + pool"
    Lp = Lc // _POOL

    # Layout plumbing in plain XLA: batch-minor (batch -> lanes), length on
    # sublanes, de-interleaved into even/odd phases so the kernel only needs
    # static sublane-offset slices.
    x_t = jnp.transpose(x, (2, 1, 0))                        # (Cin, L, B)
    if L % 2:                                                # pad to even length;
        x_t = jnp.pad(x_t, ((0, 0), (0, 1), (0, 0)))         # the pad is never read
    x_eo = jnp.stack([x_t[:, 0::2, :], x_t[:, 1::2, :]], axis=0)  # (2,Cin,Lh,B)
    Lh = x_eo.shape[2]

    w_flat = weight.reshape(Cout * Cin * K).astype(jnp.float32)   # SMEM scalars
    b_flat = bias.reshape(Cout).astype(jnp.float32)               # SMEM scalars

    # Batch tile (lanes per grid step): fill a conservative VMEM budget so the
    # double-buffered in+out blocks fit every generation's scoped VMEM.
    per_lane_bytes = 2 * 4 * (2 * Cin * Lh + Cout * Lp)      # double-buffered f32
    tb_cap = max(128, min(max_tb,
                          (vmem_budget_bytes // per_lane_bytes) // 128 * 128))
    if B <= tb_cap:
        TB, Bp = B, B                                        # single block
    else:
        TB = tb_cap                                          # multiple of 128
        Bp = pl.cdiv(B, TB) * TB
        x_eo = jnp.pad(x_eo, ((0, 0), (0, 0), (0, 0), (0, Bp - B)))
    nb = Bp // TB

    kernel = functools.partial(_cicr_conv_kernel, Cin=Cin, K=K)
    out_cf = pl.pallas_call(
        kernel,
        out_shape=jax.ShapeDtypeStruct((Cout, Lp, Bp), x.dtype),
        grid=(nb,),                                          # tiled over batch
        in_specs=[
            pl.BlockSpec((2, Cin, Lh, TB), lambda b: (0, 0, 0, b)),
            pl.BlockSpec(memory_space=pltpu.MemorySpace.SMEM),   # weights
            pl.BlockSpec(memory_space=pltpu.MemorySpace.SMEM),   # bias
        ],
        out_specs=pl.BlockSpec((Cout, Lp, TB), lambda b: (0, 0, b)),
        compiler_params=pltpu.CompilerParams(
            dimension_semantics=("parallel",),               # megacore over batch
        ),
    )(x_eo, w_flat, b_flat)

    out_cf = out_cf[:, :, :B]                                # drop batch padding
    # (Cout, Lp, B) -> (B, Lp, Cout): the module's final permute.
    return jnp.transpose(out_cf, (2, 1, 0))


def _reference(x, weight, bias, pool_size=_POOL):
    # Plain-JAX reference of the PyTorch semantics.
    B, L, Cin = x.shape
    Cout, _, K = weight.shape
    Lc = L - K + 1
    xt = jnp.transpose(x, (0, 2, 1)).astype(jnp.float32)     # (B, Cin, L)
    y = jnp.zeros((B, Cout, Lc), jnp.float32)
    for k in range(K):
        y = y + jnp.einsum("bcl,oc->bol", xt[:, :, k:k + Lc], weight[:, :, k])
    y = jnp.tanh(y + bias[None, :, None])
    Lp = Lc // pool_size
    y = jnp.max(y[:, :, :Lp * pool_size].reshape(B, Cout, Lp, pool_size), axis=-1)
    return jnp.transpose(y, (0, 2, 1))                        # (B, Lp, Cout)


if __name__ == "__main__":
    # Module defaults: feature(Cin)=1, num_kernel(Cout)=9, kernel_size=3.
    B, L, Cin, Cout, K = 2, 16, 1, 9, 3

    key = jax.random.PRNGKey(0)
    kx, kw, kb = jax.random.split(key, 3)

    x = jax.random.normal(kx, (B, L, Cin), dtype=jnp.float32)

    # Deterministic Conv1d-style init: U(-1/sqrt(fan_in), 1/sqrt(fan_in)).
    bound = 1.0 / ((Cin * K) ** 0.5)
    weight = jax.random.uniform(kw, (Cout, Cin, K), jnp.float32, -bound, bound)
    bias = jax.random.uniform(kb, (Cout,), jnp.float32, -bound, bound)

    # Tiny-batch path: single block, no grid pipelining overhead.
    out = cicr_conv_forward(x, weight, bias)
    out = jax.block_until_ready(out)
    ref = _reference(x, weight, bias)
    assert out.shape == (B, (L - K + 1) // _POOL, Cout), out.shape
    assert jnp.allclose(out, ref, atol=1e-5, rtol=1e-5), (
        float(jnp.max(jnp.abs(out - ref))))

    # Batched path: exercises the batch-tiled grid (TB=128 lanes/step) and the
    # batch-padding / output-slice logic.
    B2 = 260
    x2 = jax.random.normal(jax.random.PRNGKey(1), (B2, L, Cin), dtype=jnp.float32)
    out2 = cicr_conv_forward(x2, weight, bias, max_tb=128)
    out2 = jax.block_until_ready(out2)
    ref2 = _reference(x2, weight, bias)
    assert out2.shape == (B2, (L - K + 1) // _POOL, Cout), out2.shape
    assert jnp.allclose(out2, ref2, atol=1e-5, rtol=1e-5), (
        float(jnp.max(jnp.abs(out2 - ref2))))

    print("KERNEL_OK")
</pallas_src>

<mosaic_0001>
module attributes {stable_mosaic.version = 11 : i64} {
  func.func @_cicr_conv_kernel(%arg0: i32, %arg1: memref<2x1x8x2xf32, #tpu.memory_space<vmem>>, %arg2: memref<27xf32, #tpu.memory_space<smem>>, %arg3: memref<9xf32, #tpu.memory_space<smem>>, %arg4: memref<9x7x2xf32, #tpu.memory_space<vmem>>) attributes {dimension_semantics = [#tpu.dimension_semantics<parallel>], iteration_bounds = array<i64: 1>, scalar_prefetch = 0 : i64, scratch_operands = 0 : i64, tpu.core_type = #tpu.core_type<tc>, window_params = [{transform_indices = @transform_0, window_bounds = array<i64: 2, 1, 8, 2>}, {transform_indices = @transform_1, window_bounds = array<i64: 27>}, {transform_indices = @transform_2, window_bounds = array<i64: 9>}, {transform_indices = @transform_3, window_bounds = array<i64: 9, 7, 2>}]} {
    %c0 = arith.constant 0 : index
    %0 = memref.load %arg2[%c0] : memref<27xf32, #tpu.memory_space<smem>>
    %c0_0 = arith.constant 0 : index
    %c0_1 = arith.constant 0 : index
    %c0_2 = arith.constant 0 : index
    %c0_3 = arith.constant 0 : index
    %1 = vector.load %arg1[%c0_0, %c0_1, %c0_2, %c0_3] : memref<2x1x8x2xf32, #tpu.memory_space<vmem>>, vector<1x1x7x2xf32>
    %2 = vector.shape_cast %1 : vector<1x1x7x2xf32> to vector<7x2xf32>
    %c1 = arith.constant 1 : index
    %c0_4 = arith.constant 0 : index
    %c0_5 = arith.constant 0 : index
    %c0_6 = arith.constant 0 : index
    %3 = vector.load %arg1[%c1, %c0_4, %c0_5, %c0_6] : memref<2x1x8x2xf32, #tpu.memory_space<vmem>>, vector<1x1x7x2xf32>
    %4 = vector.shape_cast %3 : vector<1x1x7x2xf32> to vector<7x2xf32>
    %5 = vector.broadcast %0 : f32 to vector<7x2xf32>
    %6 = arith.mulf %5, %2 : vector<7x2xf32>
    %7 = vector.broadcast %0 : f32 to vector<7x2xf32>
    %8 = arith.mulf %7, %4 : vector<7x2xf32>
    %c1_7 = arith.constant 1 : index
    %9 = memref.load %arg2[%c1_7] : memref<27xf32, #tpu.memory_space<smem>>
    %c0_8 = arith.constant 0 : index
    %c0_9 = arith.constant 0 : index
    %c1_10 = arith.constant 1 : index
    %c0_11 = arith.constant 0 : index
    %10 = vector.load %arg1[%c0_8, %c0_9, %c1_10, %c0_11] : memref<2x1x8x2xf32, #tpu.memory_space<vmem>>, vector<1x1x7x2xf32>
    %11 = vector.shape_cast %10 : vector<1x1x7x2xf32> to vector<7x2xf32>
    %12 = vector.broadcast %9 : f32 to vector<7x2xf32>
    %13 = arith.mulf %12, %4 : vector<7x2xf32>
    %14 = arith.addf %6, %13 : vector<7x2xf32>
    %15 = vector.broadcast %9 : f32 to vector<7x2xf32>
    %16 = arith.mulf %15, %11 : vector<7x2xf32>
    %17 = arith.addf %8, %16 : vector<7x2xf32>
    %c2 = arith.constant 2 : index
    %18 = memref.load %arg2[%c2] : memref<27xf32, #tpu.memory_space<smem>>
    %c1_12 = arith.constant 1 : index
    %c0_13 = arith.constant 0 : index
    %c1_14 = arith.constant 1 : index
    %c0_15 = arith.constant 0 : index
    %19 = vector.load %arg1[%c1_12, %c0_13, %c1_14, %c0_15] : memref<2x1x8x2xf32, #tpu.memory_space<vmem>>, vector<1x1x7x2xf32>
    %20 = vector.shape_cast %19 : vector<1x1x7x2xf32> to vector<7x2xf32>
    %21 = vector.broadcast %18 : f32 to vector<7x2xf32>
    %22 = arith.mulf %21, %11 : vector<7x2xf32>
    %23 = arith.addf %14, %22 : vector<7x2xf32>
    %24 = vector.broadcast %18 : f32 to vector<7x2xf32>
    %25 = arith.mulf %24, %20 : vector<7x2xf32>
    %26 = arith.addf %17, %25 : vector<7x2xf32>
    %27 = arith.maximumf %23, %26 : vector<7x2xf32>
    %c0_16 = arith.constant 0 : index
    %28 = memref.load %arg3[%c0_16] : memref<9xf32, #tpu.memory_space<smem>>
    %29 = vector.broadcast %28 : f32 to vector<7x2xf32>
    %30 = arith.addf %27, %29 : vector<7x2xf32>
    %31 = math.tanh %30 : vector<7x2xf32>
    %c0_17 = arith.constant 0 : index
    %c0_18 = arith.constant 0 : index
    %c0_19 = arith.constant 0 : index
    %32 = vector.load %arg4[%c0_17, %c0_18, %c0_19] : memref<9x7x2xf32, #tpu.memory_space<vmem>>, vector<1x7x2xf32>
    %33 = vector.shape_cast %32 : vector<1x7x2xf32> to vector<7x2xf32>
    %34 = vector.shape_cast %31 : vector<7x2xf32> to vector<1x7x2xf32>
    tpu.vector_store %arg4[%c0_17, %c0_18, %c0_19], %34 {strides = array<i32>} : memref<9x7x2xf32, #tpu.memory_space<vmem>>, vector<1x7x2xf32>,
    %c3 = arith.constant 3 : index
    %35 = memref.load %arg2[%c3] : memref<27xf32, #tpu.memory_space<smem>>
    %36 = vector.broadcast %35 : f32 to vector<7x2xf32>
    %37 = arith.mulf %36, %2 : vector<7x2xf32>
    %38 = vector.broadcast %35 : f32 to vector<7x2xf32>
    %39 = arith.mulf %38, %4 : vector<7x2xf32>
    %c4 = arith.constant 4 : index
    %40 = memref.load %arg2[%c4] : memref<27xf32, #tpu.memory_space<smem>>
    %41 = vector.broadcast %40 : f32 to vector<7x2xf32>
    %42 = arith.mulf %41, %4 : vector<7x2xf32>
    %43 = arith.addf %37, %42 : vector<7x2xf32>
    %44 = vector.broadcast %40 : f32 to vector<7x2xf32>
    %45 = arith.mulf %44, %11 : vector<7x2xf32>
    %46 = arith.addf %39, %45 : vector<7x2xf32>
    %c5 = arith.constant 5 : index
    %47 = memref.load %arg2[%c5] : memref<27xf32, #tpu.memory_space<smem>>
    %48 = vector.broadcast %47 : f32 to vector<7x2xf32>
    %49 = arith.mulf %48, %11 : vector<7x2xf32>
    %50 = arith.addf %43, %49 : vector<7x2xf32>
    %51 = vector.broadcast %47 : f32 to vector<7x2xf32>
    %52 = arith.mulf %51, %20 : vector<7x2xf32>
    %53 = arith.addf %46, %52 : vector<7x2xf32>
    %54 = arith.maximumf %50, %53 : vector<7x2xf32>
    %c1_20 = arith.constant 1 : index
    %55 = memref.load %arg3[%c1_20] : memref<9xf32, #tpu.memory_space<smem>>
    %56 = vector.broadcast %55 : f32 to vector<7x2xf32>
    %57 = arith.addf %54, %56 : vector<7x2xf32>
    %58 = math.tanh %57 : vector<7x2xf32>
    %c1_21 = arith.constant 1 : index
    %c0_22 = arith.constant 0 : index
    %c0_23 = arith.constant 0 : index
    %59 = vector.load %arg4[%c1_21, %c0_22, %c0_23] : memref<9x7x2xf32, #tpu.memory_space<vmem>>, vector<1x7x2xf32>
    %60 = vector.shape_cast %59 : vector<1x7x2xf32> to vector<7x2xf32>
    %61 = vector.shape_cast %58 : vector<7x2xf32> to vector<1x7x2xf32>
    tpu.vector_store %arg4[%c1_21, %c0_22, %c0_23], %61 {strides = array<i32>} : memref<9x7x2xf32, #tpu.memory_space<vmem>>, vector<1x7x2xf32>,
    %c6 = arith.constant 6 : index
    %62 = memref.load %arg2[%c6] : memref<27xf32, #tpu.memory_space<smem>>
    %63 = vector.broadcast %62 : f32 to vector<7x2xf32>
    %64 = arith.mulf %63, %2 : vector<7x2xf32>
    %65 = vector.broadcast %62 : f32 to vector<7x2xf32>
    %66 = arith.mulf %65, %4 : vector<7x2xf32>
    %c7 = arith.constant 7 : index
    %67 = memref.load %arg2[%c7] : memref<27xf32, #tpu.memory_space<smem>>
    %68 = vector.broadcast %67 : f32 to vector<7x2xf32>
    %69 = arith.mulf %68, %4 : vector<7x2xf32>
    %70 = arith.addf %64, %69 : vector<7x2xf32>
    %71 = vector.broadcast %67 : f32 to vector<7x2xf32>
    %72 = arith.mulf %71, %11 : vector<7x2xf32>
    %73 = arith.addf %66, %72 : vector<7x2xf32>
    %c8 = arith.constant 8 : index
    %74 = memref.load %arg2[%c8] : memref<27xf32, #tpu.memory_space<smem>>
    %75 = vector.broadcast %74 : f32 to vector<7x2xf32>
    %76 = arith.mulf %75, %11 : vector<7x2xf32>
    %77 = arith.addf %70, %76 : vector<7x2xf32>
    %78 = vector.broadcast %74 : f32 to vector<7x2xf32>
    %79 = arith.mulf %78, %20 : vector<7x2xf32>
    %80 = arith.addf %73, %79 : vector<7x2xf32>
    %81 = arith.maximumf %77, %80 : vector<7x2xf32>
    %c2_24 = arith.constant 2 : index
    %82 = memref.load %arg3[%c2_24] : memref<9xf32, #tpu.memory_space<smem>>
    %83 = vector.broadcast %82 : f32 to vector<7x2xf32>
    %84 = arith.addf %81, %83 : vector<7x2xf32>
    %85 = math.tanh %84 : vector<7x2xf32>
    %c2_25 = arith.constant 2 : index
    %c0_26 = arith.constant 0 : index
    %c0_27 = arith.constant 0 : index
    %86 = vector.load %arg4[%c2_25, %c0_26, %c0_27] : memref<9x7x2xf32, #tpu.memory_space<vmem>>, vector<1x7x2xf32>
    %87 = vector.shape_cast %86 : vector<1x7x2xf32> to vector<7x2xf32>
    %88 = vector.shape_cast %85 : vector<7x2xf32> to vector<1x7x2xf32>
    tpu.vector_store %arg4[%c2_25, %c0_26, %c0_27], %88 {strides = array<i32>} : memref<9x7x2xf32, #tpu.memory_space<vmem>>, vector<1x7x2xf32>,
    %c9 = arith.constant 9 : index
    %89 = memref.load %arg2[%c9] : memref<27xf32, #tpu.memory_space<smem>>
    %90 = vector.broadcast %89 : f32 to vector<7x2xf32>
    %91 = arith.mulf %90, %2 : vector<7x2xf32>
    %92 = vector.broadcast %89 : f32 to vector<7x2xf32>
    %93 = arith.mulf %92, %4 : vector<7x2xf32>
    %c10 = arith.constant 10 : index
    %94 = memref.load %arg2[%c10] : memref<27xf32, #tpu.memory_space<smem>>
    %95 = vector.broadcast %94 : f32 to vector<7x2xf32>
    %96 = arith.mulf %95, %4 : vector<7x2xf32>
    %97 = arith.addf %91, %96 : vector<7x2xf32>
    %98 = vector.broadcast %94 : f32 to vector<7x2xf32>
    %99 = arith.mulf %98, %11 : vector<7x2xf32>
    %100 = arith.addf %93, %99 : vector<7x2xf32>
    %c11 = arith.constant 11 : index
    %101 = memref.load %arg2[%c11] : memref<27xf32, #tpu.memory_space<smem>>
    %102 = vector.broadcast %101 : f32 to vector<7x2xf32>
    %103 = arith.mulf %102, %11 : vector<7x2xf32>
    %104 = arith.addf %97, %103 : vector<7x2xf32>
    %105 = vector.broadcast %101 : f32 to vector<7x2xf32>
    %106 = arith.mulf %105, %20 : vector<7x2xf32>
    %107 = arith.addf %100, %106 : vector<7x2xf32>
    %108 = arith.maximumf %104, %107 : vector<7x2xf32>
    %c3_28 = arith.constant 3 : index
    %109 = memref.load %arg3[%c3_28] : memref<9xf32, #tpu.memory_space<smem>>
    %110 = vector.broadcast %109 : f32 to vector<7x2xf32>
    %111 = arith.addf %108, %110 : vector<7x2xf32>
    %112 = math.tanh %111 : vector<7x2xf32>
    %c3_29 = arith.constant 3 : index
    %c0_30 = arith.constant 0 : index
    %c0_31 = arith.constant 0 : index
    %113 = vector.load %arg4[%c3_29, %c0_30, %c0_31] : memref<9x7x2xf32, #tpu.memory_space<vmem>>, vector<1x7x2xf32>
    %114 = vector.shape_cast %113 : vector<1x7x2xf32> to vector<7x2xf32>
    %115 = vector.shape_cast %112 : vector<7x2xf32> to vector<1x7x2xf32>
    tpu.vector_store %arg4[%c3_29, %c0_30, %c0_31], %115 {strides = array<i32>} : memref<9x7x2xf32, #tpu.memory_space<vmem>>, vector<1x7x2xf32>,
    %c12 = arith.constant 12 : index
    %116 = memref.load %arg2[%c12] : memref<27xf32, #tpu.memory_space<smem>>
    %117 = vector.broadcast %116 : f32 to vector<7x2xf32>
    %118 = arith.mulf %117, %2 : vector<7x2xf32>
    %119 = vector.broadcast %116 : f32 to vector<7x2xf32>
    %120 = arith.mulf %119, %4 : vector<7x2xf32>
    %c13 = arith.constant 13 : index
    %121 = memref.load %arg2[%c13] : memref<27xf32, #tpu.memory_space<smem>>
    %122 = vector.broadcast %121 : f32 to vector<7x2xf32>
    %123 = arith.mulf %122, %4 : vector<7x2xf32>
    %124 = arith.addf %118, %123 : vector<7x2xf32>
    %125 = vector.broadcast %121 : f32 to vector<7x2xf32>
    %126 = arith.mulf %125, %11 : vector<7x2xf32>
    %127 = arith.addf %120, %126 : vector<7x2xf32>
    %c14 = arith.constant 14 : index
    %128 = memref.load %arg2[%c14] : memref<27xf32, #tpu.memory_space<smem>>
    %129 = vector.broadcast %128 : f32 to vector<7x2xf32>
    %130 = arith.mulf %129, %11 : vector<7x2xf32>
    %131 = arith.addf %124, %130 : vector<7x2xf32>
    %132 = vector.broadcast %128 : f32 to vector<7x2xf32>
    %133 = arith.mulf %132, %20 : vector<7x2xf32>
    %134 = arith.addf %127, %133 : vector<7x2xf32>
    %135 = arith.maximumf %131, %134 : vector<7x2xf32>
    %c4_32 = arith.constant 4 : index
    %136 = memref.load %arg3[%c4_32] : memref<9xf32, #tpu.memory_space<smem>>
    %137 = vector.broadcast %136 : f32 to vector<7x2xf32>
    %138 = arith.addf %135, %137 : vector<7x2xf32>
    %139 = math.tanh %138 : vector<7x2xf32>
    %c4_33 = arith.constant 4 : index
    %c0_34 = arith.constant 0 : index
    %c0_35 = arith.constant 0 : index
    %140 = vector.load %arg4[%c4_33, %c0_34, %c0_35] : memref<9x7x2xf32, #tpu.memory_space<vmem>>, vector<1x7x2xf32>
    %141 = vector.shape_cast %140 : vector<1x7x2xf32> to vector<7x2xf32>
    %142 = vector.shape_cast %139 : vector<7x2xf32> to vector<1x7x2xf32>
    tpu.vector_store %arg4[%c4_33, %c0_34, %c0_35], %142 {strides = array<i32>} : memref<9x7x2xf32, #tpu.memory_space<vmem>>, vector<1x7x2xf32>,
    %c15 = arith.constant 15 : index
    %143 = memref.load %arg2[%c15] : memref<27xf32, #tpu.memory_space<smem>>
    %144 = vector.broadcast %143 : f32 to vector<7x2xf32>
    %145 = arith.mulf %144, %2 : vector<7x2xf32>
    %146 = vector.broadcast %143 : f32 to vector<7x2xf32>
    %147 = arith.mulf %146, %4 : vector<7x2xf32>
    %c16 = arith.constant 16 : index
    %148 = memref.load %arg2[%c16] : memref<27xf32, #tpu.memory_space<smem>>
    %149 = vector.broadcast %148 : f32 to vector<7x2xf32>
    %150 = arith.mulf %149, %4 : vector<7x2xf32>
    %151 = arith.addf %145, %150 : vector<7x2xf32>
    %152 = vector.broadcast %148 : f32 to vector<7x2xf32>
    %153 = arith.mulf %152, %11 : vector<7x2xf32>
    %154 = arith.addf %147, %153 : vector<7x2xf32>
    %c17 = arith.constant 17 : index
    %155 = memref.load %arg2[%c17] : memref<27xf32, #tpu.memory_space<smem>>
    %156 = vector.broadcast %155 : f32 to vector<7x2xf32>
    %157 = arith.mulf %156, %11 : vector<7x2xf32>
    %158 = arith.addf %151, %157 : vector<7x2xf32>
    %159 = vector.broadcast %155 : f32 to vector<7x2xf32>
    %160 = arith.mulf %159, %20 : vector<7x2xf32>
    %161 = arith.addf %154, %160 : vector<7x2xf32>
    %162 = arith.maximumf %158, %161 : vector<7x2xf32>
    %c5_36 = arith.constant 5 : index
    %163 = memref.load %arg3[%c5_36] : memref<9xf32, #tpu.memory_space<smem>>
    %164 = vector.broadcast %163 : f32 to vector<7x2xf32>
    %165 = arith.addf %162, %164 : vector<7x2xf32>
    %166 = math.tanh %165 : vector<7x2xf32>
    %c5_37 = arith.constant 5 : index
    %c0_38 = arith.constant 0 : index
    %c0_39 = arith.constant 0 : index
    %167 = vector.load %arg4[%c5_37, %c0_38, %c0_39] : memref<9x7x2xf32, #tpu.memory_space<vmem>>, vector<1x7x2xf32>
    %168 = vector.shape_cast %167 : vector<1x7x2xf32> to vector<7x2xf32>
    %169 = vector.shape_cast %166 : vector<7x2xf32> to vector<1x7x2xf32>
    tpu.vector_store %arg4[%c5_37, %c0_38, %c0_39], %169 {strides = array<i32>} : memref<9x7x2xf32, #tpu.memory_space<vmem>>, vector<1x7x2xf32>,
    %c18 = arith.constant 18 : index
    %170 = memref.load %arg2[%c18] : memref<27xf32, #tpu.memory_space<smem>>
    %171 = vector.broadcast %170 : f32 to vector<7x2xf32>
    %172 = arith.mulf %171, %2 : vector<7x2xf32>
    %173 = vector.broadcast %170 : f32 to vector<7x2xf32>
    %174 = arith.mulf %173, %4 : vector<7x2xf32>
    %c19 = arith.constant 19 : index
    %175 = memref.load %arg2[%c19] : memref<27xf32, #tpu.memory_space<smem>>
    %176 = vector.broadcast %175 : f32 to vector<7x2xf32>
    %177 = arith.mulf %176, %4 : vector<7x2xf32>
    %178 = arith.addf %172, %177 : vector<7x2xf32>
    %179 = vector.broadcast %175 : f32 to vector<7x2xf32>
    %180 = arith.mulf %179, %11 : vector<7x2xf32>
    %181 = arith.addf %174, %180 : vector<7x2xf32>
    %c20 = arith.constant 20 : index
    %182 = memref.load %arg2[%c20] : memref<27xf32, #tpu.memory_space<smem>>
    %183 = vector.broadcast %182 : f32 to vector<7x2xf32>
    %184 = arith.mulf %183, %11 : vector<7x2xf32>
    %185 = arith.addf %178, %184 : vector<7x2xf32>
    %186 = vector.broadcast %182 : f32 to vector<7x2xf32>
    %187 = arith.mulf %186, %20 : vector<7x2xf32>
    %188 = arith.addf %181, %187 : vector<7x2xf32>
    %189 = arith.maximumf %185, %188 : vector<7x2xf32>
    %c6_40 = arith.constant 6 : index
    %190 = memref.load %arg3[%c6_40] : memref<9xf32, #tpu.memory_space<smem>>
    %191 = vector.broadcast %190 : f32 to vector<7x2xf32>
    %192 = arith.addf %189, %191 : vector<7x2xf32>
    %193 = math.tanh %192 : vector<7x2xf32>
    %c6_41 = arith.constant 6 : index
    %c0_42 = arith.constant 0 : index
    %c0_43 = arith.constant 0 : index
    %194 = vector.load %arg4[%c6_41, %c0_42, %c0_43] : memref<9x7x2xf32, #tpu.memory_space<vmem>>, vector<1x7x2xf32>
    %195 = vector.shape_cast %194 : vector<1x7x2xf32> to vector<7x2xf32>
    %196 = vector.shape_cast %193 : vector<7x2xf32> to vector<1x7x2xf32>
    tpu.vector_store %arg4[%c6_41, %c0_42, %c0_43], %196 {strides = array<i32>} : memref<9x7x2xf32, #tpu.memory_space<vmem>>, vector<1x7x2xf32>,
    %c21 = arith.constant 21 : index
    %197 = memref.load %arg2[%c21] : memref<27xf32, #tpu.memory_space<smem>>
    %198 = vector.broadcast %197 : f32 to vector<7x2xf32>
    %199 = arith.mulf %198, %2 : vector<7x2xf32>
    %200 = vector.broadcast %197 : f32 to vector<7x2xf32>
    %201 = arith.mulf %200, %4 : vector<7x2xf32>
    %c22 = arith.constant 22 : index
    %202 = memref.load %arg2[%c22] : memref<27xf32, #tpu.memory_space<smem>>
    %203 = vector.broadcast %202 : f32 to vector<7x2xf32>
    %204 = arith.mulf %203, %4 : vector<7x2xf32>
    %205 = arith.addf %199, %204 : vector<7x2xf32>
    %206 = vector.broadcast %202 : f32 to vector<7x2xf32>
    %207 = arith.mulf %206, %11 : vector<7x2xf32>
    %208 = arith.addf %201, %207 : vector<7x2xf32>
    %c23 = arith.constant 23 : index
    %209 = memref.load %arg2[%c23] : memref<27xf32, #tpu.memory_space<smem>>
    %210 = vector.broadcast %209 : f32 to vector<7x2xf32>
    %211 = arith.mulf %210, %11 : vector<7x2xf32>
    %212 = arith.addf %205, %211 : vector<7x2xf32>
    %213 = vector.broadcast %209 : f32 to vector<7x2xf32>
    %214 = arith.mulf %213, %20 : vector<7x2xf32>
    %215 = arith.addf %208, %214 : vector<7x2xf32>
    %216 = arith.maximumf %212, %215 : vector<7x2xf32>
    %c7_44 = arith.constant 7 : index
    %217 = memref.load %arg3[%c7_44] : memref<9xf32, #tpu.memory_space<smem>>
    %218 = vector.broadcast %217 : f32 to vector<7x2xf32>
    %219 = arith.addf %216, %218 : vector<7x2xf32>
    %220 = math.tanh %219 : vector<7x2xf32>
    %c7_45 = arith.constant 7 : index
    %c0_46 = arith.constant 0 : index
    %c0_47 = arith.constant 0 : index
    %221 = vector.load %arg4[%c7_45, %c0_46, %c0_47] : memref<9x7x2xf32, #tpu.memory_space<vmem>>, vector<1x7x2xf32>
    %222 = vector.shape_cast %221 : vector<1x7x2xf32> to vector<7x2xf32>
    %223 = vector.shape_cast %220 : vector<7x2xf32> to vector<1x7x2xf32>
    tpu.vector_store %arg4[%c7_45, %c0_46, %c0_47], %223 {strides = array<i32>} : memref<9x7x2xf32, #tpu.memory_space<vmem>>, vector<1x7x2xf32>,
    %c24 = arith.constant 24 : index
    %224 = memref.load %arg2[%c24] : memref<27xf32, #tpu.memory_space<smem>>
    %225 = vector.broadcast %224 : f32 to vector<7x2xf32>
    %226 = arith.mulf %225, %2 : vector<7x2xf32>
    %227 = vector.broadcast %224 : f32 to vector<7x2xf32>
    %228 = arith.mulf %227, %4 : vector<7x2xf32>
    %c25 = arith.constant 25 : index
    %229 = memref.load %arg2[%c25] : memref<27xf32, #tpu.memory_space<smem>>
    %230 = vector.broadcast %229 : f32 to vector<7x2xf32>
    %231 = arith.mulf %230, %4 : vector<7x2xf32>
    %232 = arith.addf %226, %231 : vector<7x2xf32>
    %233 = vector.broadcast %229 : f32 to vector<7x2xf32>
    %234 = arith.mulf %233, %11 : vector<7x2xf32>
    %235 = arith.addf %228, %234 : vector<7x2xf32>
    %c26 = arith.constant 26 : index
    %236 = memref.load %arg2[%c26] : memref<27xf32, #tpu.memory_space<smem>>
    %237 = vector.broadcast %236 : f32 to vector<7x2xf32>
    %238 = arith.mulf %237, %11 : vector<7x2xf32>
    %239 = arith.addf %232, %238 : vector<7x2xf32>
    %240 = vector.broadcast %236 : f32 to vector<7x2xf32>
    %241 = arith.mulf %240, %20 : vector<7x2xf32>
    %242 = arith.addf %235, %241 : vector<7x2xf32>
    %243 = arith.maximumf %239, %242 : vector<7x2xf32>
    %c8_48 = arith.constant 8 : index
    %244 = memref.load %arg3[%c8_48] : memref<9xf32, #tpu.memory_space<smem>>
    %245 = vector.broadcast %244 : f32 to vector<7x2xf32>
    %246 = arith.addf %243, %245 : vector<7x2xf32>
    %247 = math.tanh %246 : vector<7x2xf32>
    %c8_49 = arith.constant 8 : index
    %c0_50 = arith.constant 0 : index
    %c0_51 = arith.constant 0 : index
    %248 = vector.load %arg4[%c8_49, %c0_50, %c0_51] : memref<9x7x2xf32, #tpu.memory_space<vmem>>, vector<1x7x2xf32>
    %249 = vector.shape_cast %248 : vector<1x7x2xf32> to vector<7x2xf32>
    %250 = vector.shape_cast %247 : vector<7x2xf32> to vector<1x7x2xf32>
    tpu.vector_store %arg4[%c8_49, %c0_50, %c0_51], %250 {strides = array<i32>} : memref<9x7x2xf32, #tpu.memory_space<vmem>>, vector<1x7x2xf32>,
    return
  }
  func.func @transform_0(%arg0: i32) -> (i32, i32, i32, i32) {
    %c0_i32 = arith.constant 0 : i32
    %c0_i32_0 = arith.constant 0 : i32
    %c0_i32_1 = arith.constant 0 : i32
    %c0_i32_2 = arith.constant 0 : i32
    return %c0_i32, %c0_i32_0, %c0_i32_1, %arg0 : i32, i32, i32, i32
  }
  func.func @transform_1(%arg0: i32) -> i32 {
    %c0_i32 = arith.constant 0 : i32
    %c0_i32_0 = arith.constant 0 : i32
    return %c0_i32 : i32
  }
  func.func @transform_2(%arg0: i32) -> i32 {
    %c0_i32 = arith.constant 0 : i32
    %c0_i32_0 = arith.constant 0 : i32
    return %c0_i32 : i32
  }
  func.func @transform_3(%arg0: i32) -> (i32, i32, i32) {
    %c0_i32 = arith.constant 0 : i32
    %c0_i32_0 = arith.constant 0 : i32
    %c0_i32_1 = arith.constant 0 : i32
    return %c0_i32, %c0_i32_0, %arg0 : i32, i32, i32
  }
}

</mosaic_0001>

<bundles_post_ra>
// kernel: tpu_custom_call.1
= control target key start
LH: loop header
LB: loop body
LE: loop exit
PB: predicated region body
PF: predicated region fallthrough
CT: control target
= control target key end

     0   :  { %8 = vsyncpa [#allocation3], 0  ;;  %s580_s0 = inlined_call_operand.vmem [shape: f32[2,1,8,2], index: 0, kind: input, shape index: {}]   ;;  %s581_s1 = inlined_call_operand.vmem [shape: f32[27], index: 1, kind: input, shape index: {}]   ;;  %s582_s2 = inlined_call_operand.vmem [shape: f32[9], index: 2, kind: input, shape index: {}]   ;;  %s583_s3 = inlined_call_operand.vmem [shape: f32[9,7,2], index: 3, kind: output, shape index: {}]  }
   0x1   :  { %s17_s14 = sshll.u32 %s581_s1, 4  ;;  %s18_s14 = int_to_ptr.vmem [resolvable:$true] %s17_s14 }
   0x2   :  { %9 = vsyncpa [#allocation5], 0  ;;  %s26_s17 = sshll.u32 %s582_s2, 4  ;;  %s349_s18 = smov [#allocation2]   ;;  %s27_s17 = int_to_ptr.vmem [resolvable:$true] %s26_s17 }
   0x3   :  { %20 = dma.vmem_to_smem %s18_s14, 16, %s349_s18, [#allocation3]  }
   0x4   :  { %s350_s19 = smov [#allocation4]  }
   0x5   :  { %29 = dma.vmem_to_smem %s27_s17, 16, %s350_s19, [#allocation5]  }
   0x6   :  { %345 = dma.done.wait [#allocation3], 16  }
   0x7   :  { %346 = vsyncadd [#allocation3], 4294967280 }
   0x8   :  { %347 = dma.done.wait [#allocation5], 16  }
   0x9   :  { %348 = vsyncadd [#allocation5], 4294967280 }
   0xa   :  { %38 = sfence }
   0xb   :  { %s39_s20 = sld [smem:[#allocation2]]  ;;  %v382_v0 = vld [vmem:[%s580_s0] sm:$0x7f]  ;;  %v387_v1 = vld [vmem:[%s580_s0 + $0x8] sm:$0x7f]  ;;  %vm65_vm0 = vcmask 14336  }
   0xc   :  { %s258_s21 = sld [smem:[#allocation2 + $0x1]]  ;;  %v392_v2 = vld [vmem:[%s580_s0 + $0x1] sm:$0x7f]  ;;  %v397_v4 = vld [vmem:[%s580_s0 + $0x9] sm:$0x7f] }
   0xd   :  { %s259_s22 = sld [smem:[#allocation2 + $0x2]] }
   0xe   :  { %s377_s1 = sld [smem:[#allocation4]] }
   0xf   :  { %s261_s26 = sld [smem:[#allocation2 + $0x3]] }
  0x10   :  { %s262_s29 = sld [smem:[#allocation2 + $0x4]] }
  0x11   :  { %v43_v3 = vstv %s39_s20  ;;  %s399_s5 = sld [smem:[#allocation2 + $0x5]] }
  0x12   :  { %v44_v5 = vmul.f32 %v43_v3, %v382_v0  ;;  %v45_v6 = vmul.f32 %v387_v1, %v43_v3  ;;  %v48_v7 = vstv %s258_s21  ;;  %s403_s6 = sld [smem:[#allocation4 + $0x1]] }
  0x13   :  { %v49_v8 = vmul.f32 %v387_v1, %v48_v7  ;;  %v51_v9 = vmul.f32 %v48_v7, %v392_v2  ;;  %v55_v10 = vstv %s259_s22  ;;  %s407_s7 = sld [smem:[#allocation2 + $0x6]] }
  0x14   :  { %v56_v11 = vmul.f32 %v55_v10, %v392_v2  ;;  %v58_v12 = vmul.f32 %v397_v4, %v55_v10  ;;  %s411_s0 = sld [smem:[#allocation2 + $0x7]]  ;;  %v62_v23 = vstv %s377_s1 }
  0x15   :  { %v50_v13 = vadd.f32 %v49_v8, %v44_v5  ;;  %v52_v14 = vadd.f32 %v51_v9, %v45_v6  ;;  %v68_v15 = vstv %s261_s26  ;;  %s413_s8 = sld [smem:[#allocation2 + $0x8]] }
  0x16   :  { %v69_v16 = vmul.f32 %v68_v15, %v382_v0  ;;  %v70_v17 = vmul.f32 %v387_v1, %v68_v15  ;;  %v72_v18 = vstv %s262_s29  ;;  %s417_s9 = sld [smem:[#allocation4 + $0x2]] }
  0x17   :  { %v57_v19 = vadd.f32 %v56_v11, %v50_v13  ;;  %v59_v20 = vadd.f32 %v58_v12, %v52_v14  ;;  %v73_v21 = vmul.f32 %v387_v1, %v72_v18  ;;  %v75_v22 = vmul.f32 %v72_v18, %v392_v2  ;;  %s421_s10 = sld [smem:[#allocation2 + $0x9]] }
  0x18   :  { %v78_v24 = vstv %s399_s5  ;;  %s425_s11 = sld [smem:[#allocation2 + $0xa]]  ;;  %v85_v30 = vstv %s403_s6 }
  0x19   :  { %v60_v25 = vmax.f32 %v57_v19, %v59_v20  ;;  %v74_v26 = vadd.f32 %v73_v21, %v69_v16  ;;  %v76_v27 = vadd.f32 %v75_v22, %v70_v17  ;;  %v79_v28 = vmul.f32 %v78_v24, %v392_v2  ;;  %s428_s12 = sld [smem:[#allocation2 + $0xb]] }
  0x1a   :  { %v81_v29 = vmul.f32 %v397_v4, %v78_v24  ;;  %v91_v31 = vstv %s407_s7  ;;  %v95_v32 = vstv %s411_s0  ;;  %s434_s13 = sld [smem:[#allocation4 + $0x3]] }
  0x1b   :  { %v63_v33 = vadd.f32 %v62_v23, %v60_v25  ;;  %v80_v34 = vadd.f32 %v79_v28, %v74_v26  ;;  %v92_v35 = vmul.f32 %v91_v31, %v382_v0  ;;  %v93_v36 = vmul.f32 %v387_v1, %v91_v31  ;;  %s438_s14 = sld [smem:[#allocation2 + $0xc]] }
  0x1c   :  { %v82_v37 = vadd.f32 %v81_v29, %v76_v27  ;;  %v96_v38 = vmul.f32 %v387_v1, %v95_v32  ;;  %v98_v39 = vmul.f32 %v95_v32, %v392_v2  ;;  %v101_v40 = vstv %s413_s8  ;;  %s443_s15 = sld [smem:[#allocation2 + $0xd]] }
  0x1d   :  { %303 = vtanh.f32 %v63_v33  ;;  %v102_v41 = vmul.f32 %v101_v40, %v392_v2  ;;  %v104_v42 = vmul.f32 %v397_v4, %v101_v40  ;;  %v108_v43 = vstv %s417_s9  ;;  %s448_s16 = sld [smem:[#allocation2 + $0xe]] }
  0x1e   :  { %v83_v44 = vmax.f32 %v80_v34, %v82_v37  ;;  %v97_v45 = vadd.f32 %v96_v38, %v92_v35  ;;  %v99_v46 = vadd.f32 %v98_v39, %v93_v36  ;;  %v114_v47 = vstv %s421_s10  ;;  %s451_s17 = sld [smem:[#allocation4 + $0x4]] }
  0x1f   :  { %v115_v48 = vmul.f32 %v114_v47, %v382_v0  ;;  %v116_v49 = vmul.f32 %v387_v1, %v114_v47  ;;  %v118_v50 = vstv %s425_s11  ;;  %v124_v51 = vstv %s428_s12  ;;  %s457_s18 = sld [smem:[#allocation2 + $0xf]] }
  0x20   :  { %v86_v52 = vadd.f32 %v85_v30, %v83_v44  ;;  %v103_v53 = vadd.f32 %v102_v41, %v97_v45  ;;  %v105_v54 = vadd.f32 %v104_v42, %v99_v46  ;;  %v119_v55 = vmul.f32 %v387_v1, %v118_v50  ;;  %s460_s19 = sld [smem:[#allocation2 + $0x10]] }
  0x21   :  { %v121_v56 = vmul.f32 %v118_v50, %v392_v2  ;;  %v125_v57 = vmul.f32 %v124_v51, %v392_v2  ;;  %v127_v58 = vmul.f32 %v397_v4, %v124_v51  ;;  %v131_v59 = vstv %s434_s13  ;;  %s466_s20 = sld [smem:[#allocation2 + $0x11]] }
  0x22   :  { %305 = vtanh.f32 %v86_v52  ;;  %v106_v60 = vmax.f32 %v103_v53, %v105_v54  ;;  %v120_v61 = vadd.f32 %v119_v55, %v115_v48  ;;  %v137_v62 = vstv %s438_s14  ;;  %s469_s21 = sld [smem:[#allocation4 + $0x5]] }
  0x23   :  { %v304_v63 = vpop.eup %303  ;;  %v122_v3 = vadd.f32 %v121_v56, %v116_v49  ;;  %v138_v5 = vmul.f32 %v137_v62, %v382_v0  ;;  %v139_v6 = vmul.f32 %v387_v1, %v137_v62  ;;  %v141_v7 = vstv %s443_s15  ;;  %s474_s22 = sld [smem:[#allocation2 + $0x12]] }
  0x24   :  { %66 = vst.msk [vmem:[%s583_s3] sm:$0x7f] %vm65_vm0, %v304_v63  ;;  %v109_v8 = vadd.f32 %v108_v43, %v106_v60  ;;  %v126_v9 = vadd.f32 %v125_v57, %v120_v61  ;;  %v142_v10 = vmul.f32 %v387_v1, %v141_v7  ;;  %v144_v11 = vmul.f32 %v141_v7, %v392_v2  ;;  %s482_s24 = sld [smem:[#allocation2 + $0x13]] }
  0x25   :  { %v128_v12 = vadd.f32 %v127_v58, %v122_v3  ;;  %v147_v13 = vstv %s448_s16  ;;  %v154_v14 = vstv %s451_s17  ;;  %v160_v15 = vstv %s457_s18  ;;  %s487_s2 = sld [smem:[#allocation2 + $0x14]] }
  0x26   :  { %307 = vtanh.f32 %v109_v8  ;;  %v143_v16 = vadd.f32 %v142_v10, %v138_v5  ;;  %v145_v17 = vadd.f32 %v144_v11, %v139_v6  ;;  %v148_v18 = vmul.f32 %v147_v13, %v392_v2  ;;  %s490_s25 = sld [smem:[#allocation4 + $0x6]] }
  0x27   :  { %v129_v19 = vmax.f32 %v126_v9, %v128_v12  ;;  %v150_v20 = vmul.f32 %v397_v4, %v147_v13  ;;  %v161_v21 = vmul.f32 %v160_v15, %v382_v0  ;;  %v162_v22 = vmul.f32 %v387_v1, %v160_v15  ;;  %s495_s26 = sld [smem:[#allocation2 + $0x15]] }
  0x28   :  { %v306_v23 = vpop.eup %305  ;;  %v149_v24 = vadd.f32 %v148_v18, %v143_v16  ;;  %v164_v25 = vstv %s460_s19  ;;  %v170_v26 = vstv %s466_s20  ;;  %v177_v27 = vstv %s469_s21  ;;  %s500_s27 = sld [smem:[#allocation2 + $0x16]] }
  0x29   :  { %265 = vst.msk [vmem:[%s583_s3 + $0x8] sm:$0x7f] %vm65_vm0, %v306_v23  ;;  %v132_v28 = vadd.f32 %v131_v59, %v129_v19  ;;  %v151_v29 = vadd.f32 %v150_v20, %v145_v17  ;;  %v165_v30 = vmul.f32 %v387_v1, %v164_v25  ;;  %v167_v31 = vmul.f32 %v164_v25, %v392_v2  ;;  %s508_s30 = sld [smem:[#allocation2 + $0x17]] }
  0x2a   :  { %v171_v32 = vmul.f32 %v170_v26, %v392_v2  ;;  %v173_v33 = vmul.f32 %v397_v4, %v170_v26  ;;  %v183_v34 = vstv %s474_s22  ;;  %v187_v35 = vstv %s482_s24  ;;  %s514_s4 = sld [smem:[#allocation2 + $0x18]] }
  0x2b   :  { %309 = vtanh.f32 %v132_v28  ;;  %v152_v36 = vmax.f32 %v149_v24, %v151_v29  ;;  %v166_v37 = vadd.f32 %v165_v30, %v161_v21  ;;  %v168_v38 = vadd.f32 %v167_v31, %v162_v22  ;;  %s520_s5 = sld [smem:[#allocation2 + $0x19]] }
  0x2c   :  { %v308_v39 = vpop.eup %307  ;;  %v184_v40 = vmul.f32 %v183_v34, %v382_v0  ;;  %v185_v41 = vmul.f32 %v387_v1, %v183_v34  ;;  %v188_v42 = vmul.f32 %v387_v1, %v187_v35  ;;  %v190_v43 = vmul.f32 %v187_v35, %v392_v2  ;;  %s527_s0 = sld [smem:[#allocation2 + $0x1a]] }
  0x2d   :  { %270 = vst.msk [vmem:[%s583_s3 + $0x10] sm:$0x7f] %vm65_vm0, %v308_v39  ;;  %v155_v44 = vadd.f32 %v154_v14, %v152_v36  ;;  %v172_v45 = vadd.f32 %v171_v32, %v166_v37  ;;  %v174_v46 = vadd.f32 %v173_v33, %v168_v38  ;;  %v193_v47 = vstv %s487_s2  ;;  %s532_s8 = sld [smem:[#allocation4 + $0x7]] }
  0x2e   :  { %v189_v48 = vadd.f32 %v188_v42, %v184_v40  ;;  %v191_v49 = vadd.f32 %v190_v43, %v185_v41  ;;  %v194_v50 = vmul.f32 %v193_v47, %v392_v2  ;;  %v196_v51 = vmul.f32 %v397_v4, %v193_v47  ;;  %s546_s11 = sld [smem:[#allocation4 + $0x8]] }
  0x2f   :  { %311 = vtanh.f32 %v155_v44  ;;  %v175_v52 = vmax.f32 %v172_v45, %v174_v46  ;;  %v206_v53 = vstv %s495_s26  ;;  %v200_v60 = vstv %s490_s25 }
  0x30   :  { %v195_v54 = vadd.f32 %v194_v50, %v189_v48  ;;  %v197_v55 = vadd.f32 %v196_v51, %v191_v49  ;;  %v207_v56 = vmul.f32 %v206_v53, %v382_v0  ;;  %v208_v57 = vmul.f32 %v387_v1, %v206_v53 }
  0x31   :  { %v310_v58 = vpop.eup %309  ;;  %v178_v59 = vadd.f32 %v177_v27, %v175_v52  ;;  %v210_v61 = vstv %s500_s27  ;;  %v216_v62 = vstv %s508_s30  ;;  %v229_v8 = vstv %s514_s4 }
  0x32   :  { %275 = vst.msk [vmem:[%s583_s3 + $0x18] sm:$0x7f] %vm65_vm0, %v310_v58  ;;  %v198_v63 = vmax.f32 %v195_v54, %v197_v55  ;;  %v211_v3 = vmul.f32 %v387_v1, %v210_v61  ;;  %v213_v5 = vmul.f32 %v210_v61, %v392_v2  ;;  %v217_v6 = vmul.f32 %v216_v62, %v392_v2 }
  0x33   :  { %313 = vtanh.f32 %v178_v59  ;;  %v219_v7 = vmul.f32 %v397_v4, %v216_v62  ;;  %v233_v9 = vstv %s520_s5  ;;  %v230_v13 = vmul.f32 %v229_v8, %v382_v0 }
  0x34   :  { %v201_v10 = vadd.f32 %v200_v60, %v198_v63  ;;  %v212_v11 = vadd.f32 %v211_v3, %v207_v56  ;;  %v214_v12 = vadd.f32 %v213_v5, %v208_v57  ;;  %v231_v15 = vmul.f32 %v387_v1, %v229_v8 }
  0x35   :  { %v312_v14 = vpop.eup %311  ;;  %v234_v16 = vmul.f32 %v387_v1, %v233_v9  ;;  %v236_v17 = vmul.f32 %v233_v9, %v392_v2  ;;  %v239_v18 = vstv %s527_s0  ;;  %v223_v0 = vstv %s532_s8 }
  0x36   :  { %280 = vst.msk [vmem:[%s583_s3 + $0x20] sm:$0x7f] %vm65_vm0, %v312_v14  ;;  %315 = vtanh.f32 %v201_v10  ;;  %v218_v19 = vadd.f32 %v217_v6, %v212_v11  ;;  %v220_v20 = vadd.f32 %v219_v7, %v214_v12  ;;  %v240_v21 = vmul.f32 %v239_v18, %v392_v2 }
  0x37   :  { %v235_v22 = vadd.f32 %v234_v16, %v230_v13  ;;  %v237_v23 = vadd.f32 %v236_v17, %v231_v15  ;;  %v242_v24 = vmul.f32 %v397_v4, %v239_v18  ;;  %v246_v29 = vstv %s546_s11 }
  0x38   :  { %v221_v1 = vmax.f32 %v218_v19, %v220_v20 }
  0x39   :  { %v314_v25 = vpop.eup %313  ;;  %v241_v26 = vadd.f32 %v240_v21, %v235_v22  ;;  %v243_v27 = vadd.f32 %v242_v24, %v237_v23 }
  0x3a   :  { %285 = vst.msk [vmem:[%s583_s3 + $0x28] sm:$0x7f] %vm65_vm0, %v314_v25  ;;  %v224_v28 = vadd.f32 %v223_v0, %v221_v1 }
  0x3b   :  { %v244_v30 = vmax.f32 %v241_v26, %v243_v27 }
  0x3c   :  { %v316_v31 = vpop.eup %315  ;;  %317 = vtanh.f32 %v224_v28 }
  0x3d   :  { %290 = vst.msk [vmem:[%s583_s3 + $0x30] sm:$0x7f] %vm65_vm0, %v316_v31  ;;  %v247_v2 = vadd.f32 %v246_v29, %v244_v30 }
  0x3f   :  { %319 = vtanh.f32 %v247_v2 }
  0x42   :  { %v318_v4 = vpop.eup %317 }
  0x43   :  { %295 = vst.msk [vmem:[%s583_s3 + $0x38] sm:$0x7f] %vm65_vm0, %v318_v4 }
  0x45   :  { %v320_v32 = vpop.eup %319 }
  0x46   :  { %300 = vst.msk [vmem:[%s583_s3 + $0x40] sm:$0x7f] %vm65_vm0, %v320_v32 }
  0x47   :  { %255 = vsyncpa [#allocation3], 1 }
  0x48   :  { %256 = vsyncpa [#allocation5], 1 }

</bundles_post_ra>
